<compile_context>
chip_gen: v7x
topology: tpu7x:2x2x1
jax: 0.10.0
libtpu: 0.0.40
codegen_flags: <defaults>
</compile_context>

<pallas_src>
import jax
import jax.numpy as jnp
from jax.experimental import pallas as pl
from jax.experimental.pallas import tpu as pltpu


LN_EPS = 1e-5


def _round_up(x, m):
    return ((x + m - 1) // m) * m


def _mu_alpha_kernel(x_ref, w13_ref, b13_ref, w24_ref, b24_ref, gb_ref, out_ref):
    x = x_ref[...]                                                    # (TB, D) f32

    # Fused first layer: h = relu(x @ [w1 | w3] + [b1 | b3])          -> (TB, H1+H2)
    h = jnp.dot(x, w13_ref[...], preferred_element_type=jnp.float32) + b13_ref[...]
    h = jnp.maximum(h, 0.0)

    # Fused second layer with block-diagonal weights:
    #   y[:, :2] = h1 @ w2 + b2   (alpha logits)
    #   y[:, 2:] = h2 @ w4        (embed, pre-layernorm)
    y = jnp.dot(h, w24_ref[...], preferred_element_type=jnp.float32) + b24_ref[...]

    # --- alpha: exact 2-class softmax, one exp + one reciprocal ---
    a0 = y[:, 0:1]
    a1 = y[:, 1:2]
    p0 = pl.reciprocal(1.0 + jnp.exp(a1 - a0), approx=False)          # softmax[...,0]
    p1 = 1.0 - p0                                                     # softmax[...,1]

    # --- embed: LayerNorm over the feature axis ---
    e = y[:, 2:]
    mu = jnp.mean(e, axis=-1, keepdims=True)
    var = jnp.mean((e - mu) ** 2, axis=-1, keepdims=True)
    e = (e - mu) * jax.lax.rsqrt(var + LN_EPS)
    e = e * gb_ref[0:1, :] + gb_ref[1:2, :]

    # Single full-block store (one vst stream instead of three masked stores).
    out_ref[...] = jnp.concatenate([p0, p1, e], axis=-1)


def pack_params(p):
    """Fuse the two heads into two weight matrices + packed LN params.

    Call ONCE at parameter-load time (not per forward call) and pass the
    returned tuple to custom_mu_alpha.
    """
    h1 = p["w1"].shape[1]
    e_out = p["w4"].shape[1]
    w13 = jnp.concatenate([p["w1"], p["w3"]], axis=1)                 # (D, H1+H2)
    b13 = jnp.concatenate([p["b1"], p["b3"]], axis=1)                 # (1, H1+H2)
    w24 = jnp.zeros((w13.shape[1], 2 + e_out), jnp.float32)
    w24 = w24.at[:h1, :2].set(p["w2"]).at[h1:, 2:].set(p["w4"])       # block-diag
    b24 = jnp.concatenate([p["b2"], jnp.zeros((1, e_out), jnp.float32)], axis=1)
    gb = jnp.concatenate([p["ln_gamma"], p["ln_beta"]], axis=0)       # (2, E)
    return w13, b13, w24, b24, gb


def custom_mu_alpha(features, packed, *, tb=1024, min_grid_steps=2):
    """features: (B, D) float32. packed: output of pack_params (built once)."""
    B, D = features.shape
    w13, b13, w24, b24, gb = packed
    H = w13.shape[1]
    E = gb.shape[1]
    n_out = 2 + E

    # Batch tile: multiple of 8 (f32 sublane), don't over-allocate for tiny B.
    tb = max(8, min(tb, _round_up(B, 8)))
    # Ensure >= min_grid_steps grid steps when B allows, so the "parallel"
    # batch axis actually shards across both TensorCores on v7x. No-op for
    # large B (grid already long) and cheap (~0.35 us) on single-TC chips.
    if min_grid_steps > 1:
        tb = min(tb, max(8, _round_up(pl.cdiv(B, min_grid_steps), 8)))
    grid = (pl.cdiv(B, tb),)

    def resident(shape):
        return pl.BlockSpec(shape, lambda i: (0, 0))

    cost = pl.CostEstimate(
        flops=2 * B * (D * H + H * n_out),
        transcendentals=2 * B,     # one exp + one rsqrt per row (advisory only)
        bytes_accessed=4 * (B * D + B * n_out
                            + int(w13.size) + int(b13.size)
                            + int(w24.size) + int(b24.size) + int(gb.size)),
    )

    return pl.pallas_call(
        _mu_alpha_kernel,
        out_shape=jax.ShapeDtypeStruct((B, n_out), jnp.float32),
        grid=grid,
        in_specs=[
            pl.BlockSpec((tb, D), lambda i: (i, 0)),   # features: tiled over batch
            resident(w13.shape),                       # weights stay resident
            resident(b13.shape),
            resident(w24.shape),
            resident(b24.shape),
            resident(gb.shape),
        ],
        out_specs=pl.BlockSpec((tb, n_out), lambda i: (i, 0)),
        compiler_params=pltpu.CompilerParams(
            dimension_semantics=("parallel",)),        # megacore-shardable
        cost_estimate=cost,
    )(features, w13, b13, w24, b24, gb)


def init_params(key, net_arch):
    """Deterministic init mimicking nn.Linear's uniform(-1/sqrt(fan_in), ...)."""
    (d_in, h1, n_alpha), (d_in2, h2, e_out) = net_arch
    assert d_in == d_in2 and n_alpha == 2
    ks = jax.random.split(key, 4)

    def lin(k, fan_in, fan_out, bias=True):
        bound = 1.0 / jnp.sqrt(float(fan_in))
        w = jax.random.uniform(k, (fan_in, fan_out), jnp.float32, -bound, bound)
        if not bias:
            return w, None
        b = jax.random.uniform(jax.random.fold_in(k, 1), (1, fan_out),
                               jnp.float32, -bound, bound)
        return w, b

    w1, b1 = lin(ks[0], d_in, h1)
    w2, b2 = lin(ks[1], h1, n_alpha)
    w3, b3 = lin(ks[2], d_in, h2)
    w4, _ = lin(ks[3], h2, e_out, bias=False)
    return {
        "w1": w1, "b1": b1,
        "w2": w2, "b2": b2,
        "w3": w3, "b3": b3,
        "w4": w4,
        "ln_gamma": jnp.ones((1, e_out), jnp.float32),
        "ln_beta": jnp.zeros((1, e_out), jnp.float32),
    }


def reference(features, p):
    h1 = jnp.maximum(features @ p["w1"] + p["b1"], 0.0)
    alpha = jax.nn.softmax(h1 @ p["w2"] + p["b2"], axis=-1)
    h2 = jnp.maximum(features @ p["w3"] + p["b3"], 0.0)
    embed = h2 @ p["w4"]
    mu = jnp.mean(embed, axis=-1, keepdims=True)
    var = jnp.mean((embed - mu) ** 2, axis=-1, keepdims=True)
    embed = (embed - mu) / jnp.sqrt(var + LN_EPS) * p["ln_gamma"] + p["ln_beta"]
    return jnp.concatenate([alpha, embed], axis=-1)


if __name__ == "__main__":
    # net_arch = [[in, hidden1, 2], [in, hidden2, embed_dim]]
    net_arch = [[32, 32, 2], [32, 32, 8]]
    B = 16

    key = jax.random.PRNGKey(0)
    k_x, k_p = jax.random.split(key)
    features = jax.random.normal(k_x, (B, net_arch[0][0]), jnp.float32)
    params = init_params(k_p, net_arch)

    # Pack once (hoisted out of the per-call path).
    packed = jax.tree_util.tree_map(jax.block_until_ready, pack_params(params))

    ref = reference(features, params)

    # Exercise the multi-step batch grid (tb=8 -> 2 steps, both TCs on v7x).
    out_small_tile = custom_mu_alpha(features, packed, tb=8)
    jax.block_until_ready(out_small_tile)
    assert out_small_tile.shape == (B, 2 + net_arch[1][2])
    assert jnp.allclose(out_small_tile, ref, atol=1e-5, rtol=1e-5), \
        "mismatch vs JAX reference (tb=8 path)"

    # Default large-tile path (tb clamp + min_grid_steps handle tiny B).
    out_default = custom_mu_alpha(features, packed)
    jax.block_until_ready(out_default)
    assert jnp.allclose(out_default, ref, atol=1e-5, rtol=1e-5), \
        "mismatch vs JAX reference (default-tb path)"

    print("KERNEL_OK")
</pallas_src>

<mosaic_0001>
module attributes {stable_mosaic.version = 11 : i64} {
  func.func @_mu_alpha_kernel(%arg0: i32, %arg1: memref<8x32xf32, #tpu.memory_space<vmem>>, %arg2: memref<32x64xf32, #tpu.memory_space<vmem>>, %arg3: memref<1x64xf32, #tpu.memory_space<vmem>>, %arg4: memref<64x10xf32, #tpu.memory_space<vmem>>, %arg5: memref<1x10xf32, #tpu.memory_space<vmem>>, %arg6: memref<2x8xf32, #tpu.memory_space<vmem>>, %arg7: memref<8x10xf32, #tpu.memory_space<vmem>>) attributes {dimension_semantics = [#tpu.dimension_semantics<parallel>], iteration_bounds = array<i64: 2>, scalar_prefetch = 0 : i64, scratch_operands = 0 : i64, tpu.core_type = #tpu.core_type<tc>, window_params = [{transform_indices = @transform_0, window_bounds = array<i64: 8, 32>}, {pipeline_mode = #tpu.pipeline_mode<synchronous>, transform_indices = @transform_1, window_bounds = array<i64: 32, 64>}, {pipeline_mode = #tpu.pipeline_mode<synchronous>, transform_indices = @transform_2, window_bounds = array<i64: 1, 64>}, {pipeline_mode = #tpu.pipeline_mode<synchronous>, transform_indices = @transform_3, window_bounds = array<i64: 64, 10>}, {pipeline_mode = #tpu.pipeline_mode<synchronous>, transform_indices = @transform_4, window_bounds = array<i64: 1, 10>}, {pipeline_mode = #tpu.pipeline_mode<synchronous>, transform_indices = @transform_5, window_bounds = array<i64: 2, 8>}, {transform_indices = @transform_6, window_bounds = array<i64: 8, 10>}]} {
    %c0 = arith.constant 0 : index
    %c0_0 = arith.constant 0 : index
    %0 = vector.load %arg1[%c0, %c0_0] : memref<8x32xf32, #tpu.memory_space<vmem>>, vector<8x32xf32>
    %c0_1 = arith.constant 0 : index
    %c0_2 = arith.constant 0 : index
    %1 = vector.load %arg2[%c0_1, %c0_2] : memref<32x64xf32, #tpu.memory_space<vmem>>, vector<32x64xf32>
    %cst = arith.constant dense<0.000000e+00> : vector<8x64xf32>
    %2 = tpu.matmul %0, %1, %cst {dimension_numbers = #tpu.dot_dimension_numbers<[1], [0], [0], [1], [0, 0, 1, 1], [], []>} : vector<8x32xf32>, vector<32x64xf32>, vector<8x64xf32> -> vector<8x64xf32>
    %c0_3 = arith.constant 0 : index
    %c0_4 = arith.constant 0 : index
    %3 = vector.load %arg3[%c0_3, %c0_4] : memref<1x64xf32, #tpu.memory_space<vmem>>, vector<1x64xf32>
    %4 = vector.broadcast %3 : vector<1x64xf32> to vector<8x64xf32>
    %5 = arith.addf %2, %4 : vector<8x64xf32>
    %cst_5 = arith.constant 0.000000e+00 : f32
    %6 = vector.broadcast %cst_5 : f32 to vector<8x64xf32>
    %7 = arith.maximumf %5, %6 : vector<8x64xf32>
    %c0_6 = arith.constant 0 : index
    %c0_7 = arith.constant 0 : index
    %8 = vector.load %arg4[%c0_6, %c0_7] : memref<64x10xf32, #tpu.memory_space<vmem>>, vector<64x10xf32>
    %cst_8 = arith.constant dense<0.000000e+00> : vector<8x10xf32>
    %9 = tpu.matmul %7, %8, %cst_8 {dimension_numbers = #tpu.dot_dimension_numbers<[1], [0], [0], [1], [0, 0, 1, 1], [], []>} : vector<8x64xf32>, vector<64x10xf32>, vector<8x10xf32> -> vector<8x10xf32>
    %c0_9 = arith.constant 0 : index
    %c0_10 = arith.constant 0 : index
    %10 = vector.load %arg5[%c0_9, %c0_10] : memref<1x10xf32, #tpu.memory_space<vmem>>, vector<1x10xf32>
    %11 = vector.broadcast %10 : vector<1x10xf32> to vector<8x10xf32>
    %12 = arith.addf %9, %11 : vector<8x10xf32>
    %13 = vector.extract_strided_slice %12 {offsets = [0, 0], sizes = [8, 1], strides = [1, 1]} : vector<8x10xf32> to vector<8x1xf32>
    %14 = vector.extract_strided_slice %12 {offsets = [0, 1], sizes = [8, 1], strides = [1, 1]} : vector<8x10xf32> to vector<8x1xf32>
    %15 = arith.subf %14, %13 : vector<8x1xf32>
    %16 = math.exp %15 : vector<8x1xf32>
    %cst_11 = arith.constant 1.000000e+00 : f32
    %17 = vector.broadcast %cst_11 : f32 to vector<8x1xf32>
    %18 = arith.addf %17, %16 : vector<8x1xf32>
    %19 = tpu.reciprocal %18 : vector<8x1xf32> -> vector<8x1xf32>
    %cst_12 = arith.constant 1.000000e+00 : f32
    %20 = vector.broadcast %cst_12 : f32 to vector<8x1xf32>
    %21 = arith.subf %20, %19 : vector<8x1xf32>
    %22 = vector.extract_strided_slice %12 {offsets = [0, 2], sizes = [8, 8], strides = [1, 1]} : vector<8x10xf32> to vector<8x8xf32>
    %cst_13 = arith.constant dense<0.000000e+00> : vector<8xf32>
    %23 = vector.multi_reduction <add>, %22, %cst_13 [1] : vector<8x8xf32> to vector<8xf32>
    %24 = vector.shape_cast %23 : vector<8xf32> to vector<8x1xf32>
    %cst_14 = arith.constant 8.000000e+00 : f32
    %25 = vector.broadcast %cst_14 : f32 to vector<8x1xf32>
    %26 = arith.divf %24, %25 : vector<8x1xf32>
    %27 = vector.broadcast %26 : vector<8x1xf32> to vector<8x8xf32>
    %28 = arith.subf %22, %27 : vector<8x8xf32>
    %29 = arith.mulf %28, %28 : vector<8x8xf32>
    %cst_15 = arith.constant dense<0.000000e+00> : vector<8xf32>
    %30 = vector.multi_reduction <add>, %29, %cst_15 [1] : vector<8x8xf32> to vector<8xf32>
    %31 = vector.shape_cast %30 : vector<8xf32> to vector<8x1xf32>
    %cst_16 = arith.constant 8.000000e+00 : f32
    %32 = vector.broadcast %cst_16 : f32 to vector<8x1xf32>
    %33 = arith.divf %31, %32 : vector<8x1xf32>
    %34 = vector.broadcast %26 : vector<8x1xf32> to vector<8x8xf32>
    %35 = arith.subf %22, %34 : vector<8x8xf32>
    %cst_17 = arith.constant 9.99999974E-6 : f32
    %36 = vector.broadcast %cst_17 : f32 to vector<8x1xf32>
    %37 = arith.addf %33, %36 : vector<8x1xf32>
    %38 = math.rsqrt %37 : vector<8x1xf32>
    %39 = vector.broadcast %38 : vector<8x1xf32> to vector<8x8xf32>
    %40 = arith.mulf %35, %39 : vector<8x8xf32>
    %c0_18 = arith.constant 0 : index
    %c0_19 = arith.constant 0 : index
    %41 = vector.load %arg6[%c0_18, %c0_19] : memref<2x8xf32, #tpu.memory_space<vmem>>, vector<1x8xf32>
    %42 = vector.broadcast %41 : vector<1x8xf32> to vector<8x8xf32>
    %43 = arith.mulf %40, %42 : vector<8x8xf32>
    %c1 = arith.constant 1 : index
    %c0_20 = arith.constant 0 : index
    %44 = vector.load %arg6[%c1, %c0_20] : memref<2x8xf32, #tpu.memory_space<vmem>>, vector<1x8xf32>
    %45 = vector.broadcast %44 : vector<1x8xf32> to vector<8x8xf32>
    %46 = arith.addf %43, %45 : vector<8x8xf32>
    %47 = tpu.concatenate %19, %21, %46 in 1 : vector<8x1xf32>, vector<8x1xf32>, vector<8x8xf32> -> vector<8x10xf32>
    %c0_21 = arith.constant 0 : index
    %c0_22 = arith.constant 0 : index
    %48 = vector.load %arg7[%c0_21, %c0_22] : memref<8x10xf32, #tpu.memory_space<vmem>>, vector<8x10xf32>
    tpu.vector_store %arg7[%c0_21, %c0_22], %47 {strides = array<i32>} : memref<8x10xf32, #tpu.memory_space<vmem>>, vector<8x10xf32>,
    return
  }
  func.func @transform_0(%arg0: i32) -> (i32, i32) {
    %c0_i32 = arith.constant 0 : i32
    %c0_i32_0 = arith.constant 0 : i32
    return %arg0, %c0_i32 : i32, i32
  }
  func.func @transform_1(%arg0: i32) -> (i32, i32) {
    %c0_i32 = arith.constant 0 : i32
    %c0_i32_0 = arith.constant 0 : i32
    %c0_i32_1 = arith.constant 0 : i32
    return %c0_i32, %c0_i32_0 : i32, i32
  }
  func.func @transform_2(%arg0: i32) -> (i32, i32) {
    %c0_i32 = arith.constant 0 : i32
    %c0_i32_0 = arith.constant 0 : i32
    %c0_i32_1 = arith.constant 0 : i32
    return %c0_i32, %c0_i32_0 : i32, i32
  }
  func.func @transform_3(%arg0: i32) -> (i32, i32) {
    %c0_i32 = arith.constant 0 : i32
    %c0_i32_0 = arith.constant 0 : i32
    %c0_i32_1 = arith.constant 0 : i32
    return %c0_i32, %c0_i32_0 : i32, i32
  }
  func.func @transform_4(%arg0: i32) -> (i32, i32) {
    %c0_i32 = arith.constant 0 : i32
    %c0_i32_0 = arith.constant 0 : i32
    %c0_i32_1 = arith.constant 0 : i32
    return %c0_i32, %c0_i32_0 : i32, i32
  }
  func.func @transform_5(%arg0: i32) -> (i32, i32) {
    %c0_i32 = arith.constant 0 : i32
    %c0_i32_0 = arith.constant 0 : i32
    %c0_i32_1 = arith.constant 0 : i32
    return %c0_i32, %c0_i32_0 : i32, i32
  }
  func.func @transform_6(%arg0: i32) -> (i32, i32) {
    %c0_i32 = arith.constant 0 : i32
    %c0_i32_0 = arith.constant 0 : i32
    return %arg0, %c0_i32 : i32, i32
  }
}

</mosaic_0001>

<bundles_post_ra>
// kernel: tpu_custom_call.1
= control target key start
LH: loop header
LB: loop body
LE: loop exit
PB: predicated region body
PF: predicated region fallthrough
CT: control target
= control target key end

     0   :  { %11 = vsyncpa [#allocation3], 0  ;;  %s943_s0 = inlined_call_operand.vmem [shape: f32[16,32], index: 0, kind: input, shape index: {}]   ;;  %s944_s1 = inlined_call_operand.vmem [shape: f32[32,64], index: 1, kind: input, shape index: {}]   ;;  %s945_s2 = inlined_call_operand.vmem [shape: f32[1,64], index: 2, kind: input, shape index: {}]   ;;  %s946_s3 = inlined_call_operand.vmem [shape: f32[64,10], index: 3, kind: input, shape index: {}]   ;;  %s947_s4 = inlined_call_operand.vmem [shape: f32[1,10], index: 4, kind: input, shape index: {}]   ;;  %s948_s5 = inlined_call_operand.vmem [shape: f32[2,8], index: 5, kind: input, shape index: {}]   ;;  %s949_s6 = inlined_call_operand.hbm [shape: f32[16,10], index: 6, kind: output, shape index: {}]  }
   0x1   :  { %13 = vsyncpa [#allocation3 + $0x1], 0  ;;  %s795_s21 = smov 0   ;;  %s797_s22 = smov 0  }
   0x2   :  { %s799_s23 = smov 0   ;;  %s801_s24 = smov 0  }
   0x3 LB: > { %s816_s25 = sadd.s32 4294967295, %s750_s24   ;;  %s558_s26 = sadd.s32 4294967294, %s750_s24   ;;  %s750_s24 = sphi %s801_s24, %s955_s24   ;;  %s746_s23 = sphi %s799_s23, %s954_s23   ;;  %s742_s22 = sphi %s797_s22, %s953_s22   ;;  %s738_s21 = sphi %s795_s21, %s952_s21  }
   0x4   : > { %s820_s27 = sadd.s32 1, %s750_s24   ;;  %s157_s28 = sadd.s32 1, %s746_s23 }
   0x5   : > { %s154_s29 = ssub.s32 %s750_s24, %s820_s27  ;;  %p167_p0 = scmp.ne.s32.totalorder %s746_s23, %s742_s22 }
   0x6   : > { %p155_p1 = scmp.eq.s32.totalorder %s154_s29, 0  ;;  %p168_p2 = scmp.eq.s32.totalorder %s816_s25, 1 }
   0x7   : > { %p173_p3 = scmp.ne.s32.totalorder %s742_s22, %s738_s21  ;;  %p174_p4 = scmp.eq.s32.totalorder %s558_s26, 1 }
   0x8   : > { %s831_s30 = scalar_select %p155_p1, %s746_s23, %s157_s28  }
   0x9   : > { %p833_p5 = por %p168_p2, %p167_p0  ;;  %p837_p6 = por %p174_p4, %p173_p3 }
   0xa   : > { %p561_p7 = scmp.ge.s32.totalorder %s750_s24, 1  ;;  %p214_p8 = scmp.lt.s32.totalorder %s750_s24, 3 }
   0xc   : > { %p215_p9 = pnand %p561_p7, %p214_p8 }
   0xd   : > { %v248_v0 = vld [vmem:[%s944_s1] sm:$0xff] (!%p215_p9)  ;;  %v249_v1 = vld [vmem:[%s944_s1 + $0x8] sm:$0xff] (!%p215_p9)  ;;  %v250_v2 = vld [vmem:[%s944_s1 + $0x10] sm:$0xff] (!%p215_p9)  ;;  %v752_v3 = vmov (!%p215_p9), 0.0|0.0   ;;  %vm753_vm0 = vmmov (!%p215_p9), 0   ;;  %v754_v6 = vmov (!%p215_p9), 0.0  }
   0xe   : > { %218 = sbr.rel (%p215_p9) target bundleno = 1014 (0x3f6), region = 44  ;;  %618 = vmatprep.subr.bf16.mxu0 (!%p215_p9), %v752_v3  ;;  %v619_v4 = vpack.c.bf16 (!%p215_p9), %v249_v1, %v248_v0  ;;  %v251_v5 = vld [vmem:[%s944_s1 + $0x18] sm:$0xff] (!%p215_p9)  ;;  %596 = vmatprep.mubr.msk.f32.mxu0 (!%p215_p9), %vm753_vm0, %v754_v6  ;;  %p243_p10 = scmp.lt.s32.totalorder (!%p215_p9), %s816_s25, 1  ;;  %v334_v7 = vld [vmem:[%s946_s3] sm:$0xff] (!%p215_p9)  ;;  %v335_v8 = vld [vmem:[%s946_s3 + $0x8] sm:$0xff] (!%p215_p9)  ;;  %vm259_vm1 = vcmask (!%p215_p9), 261120  }
   0xf   : > { %624 = vmatprep.subr.bf16.mxu1 (!%p215_p9), %v752_v3  ;;  %v625_v9 = vpack.c.bf16 (!%p215_p9), %v335_v8, %v334_v7  ;;  %v336_v10 = vld [vmem:[%s946_s3 + $0x10] sm:$0xff] (!%p215_p9)  ;;  %v337_v11 = vld [vmem:[%s946_s3 + $0x18] sm:$0xff] (!%p215_p9)  ;;  %615 = vmatprep.mubr.msk.f32.mxu1 (!%p215_p9), %vm753_vm0, %v754_v6  ;;  %v622_v12 = vpack.c.bf16 (!%p215_p9), %v251_v5, %v250_v2  ;;  %v338_v14 = vld [vmem:[%s946_s3 + $0x20] sm:$0xff] (!%p215_p9)  ;;  %vm349_vm2 = vcmask (!%p215_p9), 523264   ;;  %s755_s12 = smov (!%p215_p9), 126   ;;  %vm436_vm3 = vcmask (!%p215_p9), 64512  }
  0x10   : > { %620 = vmatpush3.bf16.msra.mxu0 (!%p215_p9), %v619_v4  ;;  %v628_v13 = vpack.c.bf16 (!%p215_p9), %v337_v11, %v336_v10  ;;  %v339_v15 = vld [vmem:[%s946_s3 + $0x28] sm:$0xff] (!%p215_p9)  ;;  %v340_v18 = vld [vmem:[%s946_s3 + $0x30] sm:$0xff] (!%p215_p9)  ;;  %v341_v19 = vld [vmem:[%s946_s3 + $0x38] sm:$0xff] (!%p215_p9)  ;;  %s756_s13 = smov (!%p215_p9), 1   ;;  %s757_s16 = smov (!%p215_p9), 2   ;;  %vm479_vm4 = vcmask (!%p215_p9), 7168  }
  0x11   : > { %621 = vmatprep.subr.bf16.mxu0 (!%p215_p9), %v752_v3  ;;  %626 = vmatpush3.bf16.msra.mxu1 (!%p215_p9), %v625_v9  ;;  %v631_v17 = vpack.c.bf16 (!%p215_p9), %v339_v15, %v338_v14  ;;  %v634_v20 = vpack.c.bf16 (!%p215_p9), %v341_v19, %v340_v18  ;;  %v564_v21 = vld [vmem:[%s945_s2] ss:$0 sm:$0xff] (!%p215_p9)  ;;  %v569_v42 = vld [vmem:[%s948_s5 + $0x1] ss:$0 sm:$0xff] (!%p215_p9)  ;;  %s758_s19 = smov (!%p215_p9), 127   ;;  %s240_s20 = sand.u32 (!%p215_p9), 1, %s742_s22  }
  0x12   : > { %627 = vmatprep.subr.bf16.mxu1 (!%p215_p9), %v752_v3  ;;  %v566_v26 = vld [vmem:[%s947_s4] ss:$0 sm:$0xff] (!%p215_p9)  ;;  %s562_s26 = sshll.u32 (!%p215_p9), %s240_s20, 3  ;;  %s571_s28 = sshll.u32 (!%p215_p9), %s816_s25, 7  ;;  %vm481_vm5 = vcmask (!%p215_p9), 15360   ;;  %vm483_vm6 = vcmask (!%p215_p9), 80896  }
  0x13   : > { %v568_v36 = vld [vmem:[%s948_s5] ss:$0 sm:$0xff] (!%p215_p9)  ;;  %s242_s29 = scalar_lea.vmem (!%p215_p9), [#allocation2], %s562_s26  ;;  %s759_s14 = smov (!%p215_p9), [#allocation2]  }
  0x14   : > { %623 = vmatpush3.bf16.msra.mxu0 (!%p215_p9), %v622_v12  ;;  %s499_s9 = sshll.u32 (!%p215_p9), %s242_s29, 4  ;;  %s692_s15 = sshll.u32 (!%p215_p9), %s759_s14, 4  ;;  %s903_s9 = int_to_ptr.vmem [resolvable:$true] %s499_s9  ;;  %s693_s15 = int_to_ptr.vmem [resolvable:$false] %s692_s15 }
  0x15   : > { %s244_s10 = scalar_select %p243_p10, %s816_s25, 1  ;;  %629 = vmatpush3.bf16.msra.mxu1 %v628_v13 }
  0x16   : > { %630 = vmatprep.subr.bf16.mxu1 %v752_v3  ;;  %s486_s25 = scalar_lea.sflag [#allocation3], %s240_s20  ;;  %p695_p0 = scmp.lt.s32.totalorder %s903_s9, %s693_s15 }
  0x17   : > { %s563_s11 = sshll.u32 %s244_s10, 3 }
  0x18   : > { %s246_s18 = scalar_lea.vmem %s943_s0, %s563_s11 }
  0x19   : > { %v247_v16 = vld [vmem:[%s246_s18] sm:$0xff]  ;;  %632 = vmatpush3.bf16.msra.mxu1 %v631_v17 }
  0x1a   : > { %597 = vmatmul.mubr.msk.f32.vlgmr.msra.gmra.mrb[0].mxu0 %vm259_vm1, %v247_v16  ;;  %633 = vmatprep.subr.bf16.mxu1 %v752_v3 }
  0x1d   : > { %635 = vmatpush3.bf16.msra.mxu1 %v634_v20 }
  0xed   : > { %v329_v22 = vpop.f32.mrb[0].mxu0 }
  0xee   : > { %v330_v23 = vadd.f32 %v564_v21, %v329_v22  ;;  %v598_v24 = vpop.f32.mrb[1].mxu0 }
  0xf0   : > { %v333_v25 = vmax.f32 %v330_v23, 0.0 }
  0xf2   : > { %616 = vmatmul.mubr.msk.f32.vlgmr.msra.gmra.mrb[0].mxu1 %vm349_vm2, %v333_v25 }
 0x1c5   : > { %v419_v27 = vpop.f32.mrb[0].mxu1 }
 0x1c6   : > { %v420_v28 = vadd.f32 %v566_v26, %v419_v27  ;;  %v617_v29 = vpop.f32.mrb[1].mxu1 }
 0x1c8   : > { %433 = vrot.lane.b32.xlu0 %v420_v28, %s755_s12 }
 0x23a   : > { %v434_v30 = vpop.permute.xlu0 %433 }
 0x23b   : > { %v437_v31 = vsel %vm436_vm3, %v434_v30, 0.0 }
 0x23c   : > { %438 = vadd.xlane.f32.xlu0 %v437_v31 }
 0x252   : > { %461 = vrot.lane.b32.xlu0 %v568_v36, %s757_s16 }
 0x2c9   : > { %v439_v32 = vpop.xlane.xlu0 %438 }
 0x2ca   : > { %v441_v33 = vmul.f32 0.125, %v439_v32 }
 0x2cc   : > { %v442_v34 = vsub.f32 %v420_v28, %v441_v33 }
 0x2cd   : > { %v462_v49 = vpop.permute.xlu0 %461 }
 0x2ce   : > { %v443_v35 = vmul.f32 %v442_v34, %v442_v34 }
 0x2d0   : > { %445 = vrot.lane.b32.xlu1 %v443_v35, %s755_s12  ;;  %s901_s12 = scalar_lea.hbm %s949_s6, %s571_s28 }
 0x2d4   : > { %424 = vrot.lane.b32.xlu1 %v420_v28, %s756_s13  ;;  %s688_s13 = scalar_lea.vmem %s903_s9, 128 }
 0x2d5   : > { %p689_p11 = scmp.ne.s32.totalorder %s903_s9, %s688_s13 }
 0x2d7   : > { %p690_p12 = pnand %p689_p11, %p833_p5 }
 0x2d9   : > { %p691_p13 = pneg %p690_p12 }
 0x342   : > { %v446_v37 = vpop.permute.xlu1 %445 }
 0x343   : > { %v448_v38 = vsel %vm436_vm3, %v446_v37, 0.0 }
 0x344   : > { %449 = vadd.xlane.f32.xlu1 %v448_v38 }
 0x346   : > { %v425_v39 = vpop.permute.xlu1 %424 }
 0x347   : > { %v427_v40 = vsub.f32 %v420_v28, %v425_v39 }
 0x349   : > { %v428_v41 = vmul.f32 1.442695, %v427_v40 }
 0x34b   : > { %682 = vpow2.f32 %v428_v41 }
 0x355   : > { %v683_v43 = vpop.eup %682  ;;  %471 = vrot.lane.b32.xlu1 %v569_v42, %s757_s16  ;;  %s694_s16 = scalar_lea.vmem %s693_s15, 256 }
 0x356   : > { %v430_v44 = vadd.f32 1.0, %v683_v43  ;;  %p696_p1 = scmp.lt.s32.totalorder %s694_s16, %s688_s13 }
 0x358   : > { %684 = vrcp.f32 %v430_v44  ;;  %p697_p2 = por %p696_p1, %p695_p0 }
 0x35a   : > { %p698_p3 = pnand %p697_p2, %p691_p13 }
 0x362   : > { %v685_v45 = vpop.eup %684 }
 0x363   : > { %476 = vrot.lane.b32.xlu0 %v685_v45, %s758_s19  ;;  %v432_v55 = vsub.f32 1.0, %v685_v45 }
 0x3d1   : > { %v450_v46 = vpop.xlane.xlu1 %449 }
 0x3d2   : > { %v451_v47 = vmul.f32 0.125, %v450_v46 }
 0x3d4   : > { %v452_v48 = vadd.f32 1e-05, %v451_v47 }
 0x3d5   : > { %v472_v52 = vpop.permute.xlu1 %471  ;;  %v477_v54 = vpop.permute.xlu0 %476 }
 0x3d6   : > { %686 = vrsqrt.f32 %v452_v48  ;;  %v480_v57 = vsel %vm479_vm4, %v477_v54, %v432_v55 }
 0x3e0   : > { %v687_v50 = vpop.eup %686 }
 0x3e1   : > { %v454_v51 = vmul.f32 %v687_v50, %v442_v34 }
 0x3e3   : > { %v464_v53 = vmul.f32 %v462_v49, %v454_v51 }
 0x3e5   : > { %v474_v56 = vadd.f32 %v472_v52, %v464_v53 }
 0x3e7   : > { %v482_v58 = vsel %vm481_vm5, %v480_v57, %v474_v56 }
 0x3e8   : > { %484 = vst.msk [vmem:[%s242_s29] sm:$0xff] %vm483_vm6, %v482_v58 }
 0x3e9   : > { %701 = shalt.err (!%p698_p3)
}
 0x3ea   : > { %s702_s17 = scalar_lea.hbm %s901_s12, 128  ;;  %s706_s20 = scalar_lea.hbm %s949_s6, 256 }
 0x3eb   : > { %p703_p4 = scmp.ne.s32.totalorder %s901_s12, %s702_s17  ;;  %p707_p9 = scmp.lt.u32.totalorder %s901_s12, %s949_s6 }
 0x3ec   : > { %p708_p10 = scmp.lt.u32.totalorder %s706_s20, %s702_s17  ;;  %p710_p12 = scmp.lt.u32.totalorder %s702_s17, %s901_s12 }
 0x3ed   : > { %p704_p7 = pnand %p703_p4, %p833_p5 }
 0x3ee   : > { %p709_p11 = por %p708_p10, %p707_p9 }
 0x3ef   : > { %p705_p8 = pneg %p704_p7 }
 0x3f0   : > { %p711_p13 = por %p710_p12, %p709_p11 }
 0x3f2   : > { %p712_p0 = pnand %p711_p13, %p705_p8 }
 0x3f4   : > { %715 = shalt.err (!%p712_p0)
}
 0x3f5   : > { %636 = dma.vmem_to_hbm [thread:$0]  (%p833_p5), %s903_s9, 128, %s901_s12, %s486_s25  }
 0x3f6 PF: > { %p642_p1 = scmp.ge.s32.totalorder %s750_s24, 2  ;;  %s511_s29 = sand.u32 1, %s738_s21  }
 0x3f7   : > { %s512_s10 = scalar_lea.sflag [#allocation3], %s511_s29 }
 0x3f8   : > { %p639_p2 = pnand %p642_p1, %p837_p6 }
 0x3fa   : > { %733 = dma.done.wait (!%p639_p2), %s512_s10, 128  }
 0x3fb   : > { %735 = vsyncadd (!%p639_p2), %s512_s10, 4294967168  ;;  %p16_p3 = scmp.ge.s32.totalorder %s820_s27, 4   ;;  %s952_s21 = smov %s742_s22 }
 0x3fc   : > { %s953_s22 = smov %s746_s23  ;;  %s954_s23 = smov %s831_s30 }
 0x3fd   : > { %s955_s24 = smov %s820_s27  ;;  %18 = sbr.rel (!%p16_p3) target bundleno = 3 (0x3), region = 79 }
 0x404   :  { %517 = vsyncpa [#allocation3], 1 }
 0x405   :  { %519 = vsyncpa [#allocation3 + $0x1], 1 }

</bundles_post_ra>
